<compile_context>
chip_gen: v7x
topology: tpu7x:2x2x1
jax: 0.10.0
libtpu: 0.0.40
codegen_flags: <defaults>
</compile_context>

<pallas_src>
import functools

import jax
import jax.numpy as jnp
from jax import lax
from jax.experimental import pallas as pl
from jax.experimental.pallas import tpu as pltpu


def _cbow_kernel(x_ref, acts_ref, ws_ref, wa_ref, b1_ref, w2_ref, b2_ref,
                 out_ref, *, n_actions):
    """Fused forward.

    x_ref    : (bb, 3*state_dim)   concatenated [s1 | s2 | s3]
    acts_ref : (bb, 2) int32       packed [a1 | a3] ids
    ws_ref   : (3*state_dim, H)    folded state weights
    wa_ref   : (2*n_actions, H)    folded [onehot(a1) | onehot(a3)] weights
    b1_ref   : (1, H)              fc[0] bias with state-embedding bias folded in
    w2_ref   : (H, N_pad)          fc[2] weight, zero-padded to lane-dense N
    b2_ref   : (1, N_pad)          fc[2] bias, zero-padded
    out_ref  : (bb, N_pad)
    """
    bb = x_ref.shape[0]

    # First layer, part 1: one dot over the concatenated state slots.
    d_s = jnp.dot(x_ref[...], ws_ref[...], preferred_element_type=jnp.float32)

    # First layer, part 2: combined (a1, a3) one-hot built in-kernel, one dot.
    a1 = acts_ref[:, 0:1]
    a3 = acts_ref[:, 1:2]
    ids = lax.broadcasted_iota(jnp.int32, (bb, 2 * n_actions), 1)
    oh = ((ids == a1) | (ids == (a3 + n_actions))).astype(jnp.float32)
    d_a = jnp.dot(oh, wa_ref[...], preferred_element_type=jnp.float32)

    # Bias + ReLU, then fc[2].
    h = jnp.maximum(d_s + d_a + b1_ref[...], 0.0)
    out_ref[...] = (jnp.dot(h, w2_ref[...], preferred_element_type=jnp.float32)
                    + b2_ref[...]).astype(out_ref.dtype)


def fold_params(params, *, lane_pad=128):
    """Fold state_embedding / action_embedding into fc[0] and make fc[2]
    lane-dense.  Exact algebra; done once, offline."""
    ws, bs, emb, w1, b1, w2, b2 = params
    E = ws.shape[1]
    H = w1.shape[1]
    w1_s1 = w1[0 * E:1 * E]
    w1_a1 = w1[1 * E:2 * E]
    w1_s2 = w1[2 * E:3 * E]
    w1_s3 = w1[3 * E:4 * E]
    w1_a3 = w1[4 * E:5 * E]

    # Matches the wrapper's concat order [s1 | s2 | s3]:
    w_state = jnp.concatenate([ws @ w1_s1, ws @ w1_s2, ws @ w1_s3], axis=0)  # (3*SD, H)
    # Matches the in-kernel combined one-hot order [onehot(a1) | onehot(a3)]:
    w_act = jnp.concatenate([emb @ w1_a1, emb @ w1_a3], axis=0)              # (2*NA, H)
    b1c = (b1 + bs @ (w1_s1 + w1_s2 + w1_s3)).reshape(1, H)                  # (1, H)

    # Zero-pad fc[2] to a multiple of `lane_pad` output columns (unmasked vst).
    n_out = w2.shape[1]
    n_pad = lane_pad * ((n_out + lane_pad - 1) // lane_pad)
    w2p = jnp.zeros((H, n_pad), w2.dtype).at[:, :n_out].set(w2)
    b2p = jnp.zeros((1, n_pad), b2.dtype).at[:, :n_out].set(b2.reshape(1, -1))
    return (w_state, w_act, b1c, w2p, b2p)


def state_action_prediction(s1, a1, s2, s3, a3, folded_params, *, block_b=None):
    """Forward pass. s1/s2/s3: (B, state_dim) f32; a1/a3: (B,) int ids."""
    w_state, w_act, b1c, w2p, b2p = folded_params
    B, state_dim = s1.shape
    n_actions = w_act.shape[0] // 2
    n_pad = w2p.shape[1]

    # Dense inputs for the kernel: one state slab, one packed action-id slab.
    s_cat = jnp.concatenate([s1, s2, s3], axis=-1)                      # (B, 3*SD)
    acts = jnp.stack([a1.astype(jnp.int32), a3.astype(jnp.int32)], -1)  # (B, 2)

    # Batch tiling: big tiles amortize the ~0.35 us/step grid overhead.
    # At block_b=2048 total VMEM (lane-padded, double-buffered) is a few MiB,
    # well under v7x's 32 MiB scoped default.  For v7x dual-TC use, pass a
    # block_b that yields grid_b >= 2 when B is large.
    if block_b is None:
        block_b = min(B, 2048)
    block_b = min(block_b, B)
    if block_b < B:
        block_b = max(8, (block_b // 8) * 8)   # (8, 128) sublane constraint
    grid_b = pl.cdiv(B, block_b)

    def batch_spec(cols):
        return pl.BlockSpec((block_b, cols), lambda i: (i, 0))

    def resident_spec(shape):
        nd = len(shape)
        return pl.BlockSpec(shape, lambda i, _n=nd: (0,) * _n)

    kernel = functools.partial(_cbow_kernel, n_actions=n_actions)

    out_padded = pl.pallas_call(
        kernel,
        out_shape=jax.ShapeDtypeStruct((B, n_pad), jnp.float32),
        grid=(grid_b,),
        in_specs=[
            batch_spec(3 * state_dim),     # [s1|s2|s3]
            batch_spec(2),                 # packed [a1|a3] ids
            resident_spec(w_state.shape),  # (3*SD, H)
            resident_spec(w_act.shape),    # (2*NA, H)
            resident_spec(b1c.shape),      # (1, H)
            resident_spec(w2p.shape),      # (H, N_pad)
            resident_spec(b2p.shape),      # (1, N_pad)
        ],
        out_specs=batch_spec(n_pad),
        compiler_params=pltpu.CompilerParams(
            dimension_semantics=("parallel",),
            vmem_limit_bytes=32 << 20),
    )(s_cat, acts, w_state, w_act, b1c, w2p, b2p)

    # Drop the zero-padded logit columns.
    return out_padded[:, :n_actions]


def init_params(key, state_dim, n_actions, embedding_size=16, context_size=5,
                hidden=128):
    """Deterministic parameter init (uniform fan-in, PyTorch-style ranges)."""
    ks = jax.random.split(key, 7)

    def unif(k, shape, fan_in):
        bound = 1.0 / jnp.sqrt(fan_in)
        return jax.random.uniform(k, shape, jnp.float32, -bound, bound)

    ws = unif(ks[0], (state_dim, embedding_size), state_dim)
    bs = unif(ks[1], (embedding_size,), state_dim)
    emb = jax.random.normal(ks[2], (n_actions, embedding_size), jnp.float32)
    w1 = unif(ks[3], (embedding_size * context_size, hidden),
              embedding_size * context_size)
    b1 = unif(ks[4], (hidden,), embedding_size * context_size)
    w2 = unif(ks[5], (hidden, n_actions), hidden)
    b2 = unif(ks[6], (n_actions,), hidden)
    return (ws, bs, emb, w1, b1, w2, b2)


def _reference(s1, a1, s2, s3, a3, params):
    ws, bs, emb, w1, b1, w2, b2 = params
    s1e = s1 @ ws + bs
    s2e = s2 @ ws + bs
    s3e = s3 @ ws + bs
    a1e = emb[a1]
    a3e = emb[a3]
    ctx = jnp.concatenate([s1e, a1e, s2e, s3e, a3e], axis=-1)
    h = jnp.maximum(ctx @ w1 + b1, 0.0)
    return h @ w2 + b2


# TODO(synk): train() (CrossEntropyLoss + Adam) and compute_distance() are
# training/analysis utilities, not part of forward; not implemented here.

if __name__ == "__main__":
    B = 8
    state_dim = 4
    n_actions = 6
    embedding_size = 16
    context_size = 5

    key = jax.random.PRNGKey(0)
    kp, k1, k2, k3, k4, k5 = jax.random.split(key, 6)

    params = init_params(kp, state_dim, n_actions, embedding_size, context_size)
    folded = fold_params(params)

    s1 = jax.random.normal(k1, (B, state_dim), jnp.float32)
    s2 = jax.random.normal(k2, (B, state_dim), jnp.float32)
    s3 = jax.random.normal(k3, (B, state_dim), jnp.float32)
    a1 = jax.random.randint(k4, (B,), 0, n_actions, jnp.int32)
    a3 = jax.random.randint(k5, (B,), 0, n_actions, jnp.int32)

    out = state_action_prediction(s1, a1, s2, s3, a3, folded)
    out = jax.block_until_ready(out)

    ref = _reference(s1, a1, s2, s3, a3, params)
    assert out.shape == (B, n_actions)
    assert jnp.allclose(out, ref, atol=1e-4, rtol=1e-4)

    print("KERNEL_OK")
</pallas_src>

<mosaic_0001>
module attributes {stable_mosaic.version = 11 : i64} {
  func.func @_cbow_kernel(%arg0: i32, %arg1: memref<8x12xf32, #tpu.memory_space<vmem>>, %arg2: memref<8x2xi32, #tpu.memory_space<vmem>>, %arg3: memref<12x128xf32, #tpu.memory_space<vmem>>, %arg4: memref<12x128xf32, #tpu.memory_space<vmem>>, %arg5: memref<1x128xf32, #tpu.memory_space<vmem>>, %arg6: memref<128x128xf32, #tpu.memory_space<vmem>>, %arg7: memref<1x128xf32, #tpu.memory_space<vmem>>, %arg8: memref<8x128xf32, #tpu.memory_space<vmem>>) attributes {dimension_semantics = [#tpu.dimension_semantics<parallel>], iteration_bounds = array<i64: 1>, scalar_prefetch = 0 : i64, scratch_operands = 0 : i64, tpu.core_type = #tpu.core_type<tc>, window_params = [{transform_indices = @transform_0, window_bounds = array<i64: 8, 12>}, {transform_indices = @transform_1, window_bounds = array<i64: 8, 2>}, {pipeline_mode = #tpu.pipeline_mode<synchronous>, transform_indices = @transform_2, window_bounds = array<i64: 12, 128>}, {pipeline_mode = #tpu.pipeline_mode<synchronous>, transform_indices = @transform_3, window_bounds = array<i64: 12, 128>}, {pipeline_mode = #tpu.pipeline_mode<synchronous>, transform_indices = @transform_4, window_bounds = array<i64: 1, 128>}, {pipeline_mode = #tpu.pipeline_mode<synchronous>, transform_indices = @transform_5, window_bounds = array<i64: 128, 128>}, {pipeline_mode = #tpu.pipeline_mode<synchronous>, transform_indices = @transform_6, window_bounds = array<i64: 1, 128>}, {transform_indices = @transform_7, window_bounds = array<i64: 8, 128>}]} {
    %c0 = arith.constant 0 : index
    %c0_0 = arith.constant 0 : index
    %0 = vector.load %arg1[%c0, %c0_0] : memref<8x12xf32, #tpu.memory_space<vmem>>, vector<8x12xf32>
    %c0_1 = arith.constant 0 : index
    %c0_2 = arith.constant 0 : index
    %1 = vector.load %arg3[%c0_1, %c0_2] : memref<12x128xf32, #tpu.memory_space<vmem>>, vector<12x128xf32>
    %cst = arith.constant dense<0.000000e+00> : vector<8x128xf32>
    %2 = tpu.matmul %0, %1, %cst {dimension_numbers = #tpu.dot_dimension_numbers<[1], [0], [0], [1], [0, 0, 1, 1], [], []>} : vector<8x12xf32>, vector<12x128xf32>, vector<8x128xf32> -> vector<8x128xf32>
    %c0_3 = arith.constant 0 : index
    %c0_4 = arith.constant 0 : index
    %3 = vector.load %arg2[%c0_3, %c0_4] : memref<8x2xi32, #tpu.memory_space<vmem>>, vector<8x1xi32>
    %c0_5 = arith.constant 0 : index
    %c1 = arith.constant 1 : index
    %4 = vector.load %arg2[%c0_5, %c1] : memref<8x2xi32, #tpu.memory_space<vmem>>, vector<8x1xi32>
    %5 = tpu.iota {dimensions = array<i32: 1>} : vector<8x12xi32>
    %6 = vector.broadcast %3 : vector<8x1xi32> to vector<8x12xi32>
    %7 = arith.cmpi eq, %5, %6 : vector<8x12xi32>
    %c6_i32 = arith.constant 6 : i32
    %8 = vector.broadcast %c6_i32 : i32 to vector<8x1xi32>
    %9 = arith.addi %4, %8 : vector<8x1xi32>
    %10 = vector.broadcast %9 : vector<8x1xi32> to vector<8x12xi32>
    %11 = arith.cmpi eq, %5, %10 : vector<8x12xi32>
    %12 = arith.ori %7, %11 : vector<8x12xi1>
    %13 = arith.extui %12 : vector<8x12xi1> to vector<8x12xi32>
    %14 = arith.sitofp %13 : vector<8x12xi32> to vector<8x12xf32>
    %c0_6 = arith.constant 0 : index
    %c0_7 = arith.constant 0 : index
    %15 = vector.load %arg4[%c0_6, %c0_7] : memref<12x128xf32, #tpu.memory_space<vmem>>, vector<12x128xf32>
    %cst_8 = arith.constant dense<0.000000e+00> : vector<8x128xf32>
    %16 = tpu.matmul %14, %15, %cst_8 {dimension_numbers = #tpu.dot_dimension_numbers<[1], [0], [0], [1], [0, 0, 1, 1], [], []>} : vector<8x12xf32>, vector<12x128xf32>, vector<8x128xf32> -> vector<8x128xf32>
    %17 = arith.addf %2, %16 : vector<8x128xf32>
    %c0_9 = arith.constant 0 : index
    %c0_10 = arith.constant 0 : index
    %18 = vector.load %arg5[%c0_9, %c0_10] : memref<1x128xf32, #tpu.memory_space<vmem>>, vector<1x128xf32>
    %19 = vector.broadcast %18 : vector<1x128xf32> to vector<8x128xf32>
    %20 = arith.addf %17, %19 : vector<8x128xf32>
    %cst_11 = arith.constant 0.000000e+00 : f32
    %21 = vector.broadcast %cst_11 : f32 to vector<8x128xf32>
    %22 = arith.maximumf %20, %21 : vector<8x128xf32>
    %c0_12 = arith.constant 0 : index
    %c0_13 = arith.constant 0 : index
    %23 = vector.load %arg6[%c0_12, %c0_13] : memref<128x128xf32, #tpu.memory_space<vmem>>, vector<128x128xf32>
    %cst_14 = arith.constant dense<0.000000e+00> : vector<8x128xf32>
    %24 = tpu.matmul %22, %23, %cst_14 {dimension_numbers = #tpu.dot_dimension_numbers<[1], [0], [0], [1], [0, 0, 1, 1], [], []>} : vector<8x128xf32>, vector<128x128xf32>, vector<8x128xf32> -> vector<8x128xf32>
    %c0_15 = arith.constant 0 : index
    %c0_16 = arith.constant 0 : index
    %25 = vector.load %arg7[%c0_15, %c0_16] : memref<1x128xf32, #tpu.memory_space<vmem>>, vector<1x128xf32>
    %26 = vector.broadcast %25 : vector<1x128xf32> to vector<8x128xf32>
    %27 = arith.addf %24, %26 : vector<8x128xf32>
    %c0_17 = arith.constant 0 : index
    %c0_18 = arith.constant 0 : index
    %28 = vector.load %arg8[%c0_17, %c0_18] : memref<8x128xf32, #tpu.memory_space<vmem>>, vector<8x128xf32>
    tpu.vector_store %arg8[%c0_17, %c0_18], %27 {strides = array<i32>} : memref<8x128xf32, #tpu.memory_space<vmem>>, vector<8x128xf32>,
    return
  }
  func.func @transform_0(%arg0: i32) -> (i32, i32) {
    %c0_i32 = arith.constant 0 : i32
    %c0_i32_0 = arith.constant 0 : i32
    return %arg0, %c0_i32 : i32, i32
  }
  func.func @transform_1(%arg0: i32) -> (i32, i32) {
    %c0_i32 = arith.constant 0 : i32
    %c0_i32_0 = arith.constant 0 : i32
    return %arg0, %c0_i32 : i32, i32
  }
  func.func @transform_2(%arg0: i32) -> (i32, i32) {
    %c0_i32 = arith.constant 0 : i32
    %c0_i32_0 = arith.constant 0 : i32
    %c0_i32_1 = arith.constant 0 : i32
    return %c0_i32, %c0_i32_0 : i32, i32
  }
  func.func @transform_3(%arg0: i32) -> (i32, i32) {
    %c0_i32 = arith.constant 0 : i32
    %c0_i32_0 = arith.constant 0 : i32
    %c0_i32_1 = arith.constant 0 : i32
    return %c0_i32, %c0_i32_0 : i32, i32
  }
  func.func @transform_4(%arg0: i32) -> (i32, i32) {
    %c0_i32 = arith.constant 0 : i32
    %c0_i32_0 = arith.constant 0 : i32
    %c0_i32_1 = arith.constant 0 : i32
    return %c0_i32, %c0_i32_0 : i32, i32
  }
  func.func @transform_5(%arg0: i32) -> (i32, i32) {
    %c0_i32 = arith.constant 0 : i32
    %c0_i32_0 = arith.constant 0 : i32
    %c0_i32_1 = arith.constant 0 : i32
    return %c0_i32, %c0_i32_0 : i32, i32
  }
  func.func @transform_6(%arg0: i32) -> (i32, i32) {
    %c0_i32 = arith.constant 0 : i32
    %c0_i32_0 = arith.constant 0 : i32
    %c0_i32_1 = arith.constant 0 : i32
    return %c0_i32, %c0_i32_0 : i32, i32
  }
  func.func @transform_7(%arg0: i32) -> (i32, i32) {
    %c0_i32 = arith.constant 0 : i32
    %c0_i32_0 = arith.constant 0 : i32
    return %arg0, %c0_i32 : i32, i32
  }
}

</mosaic_0001>

<bundles_post_ra>
// kernel: tpu_custom_call.1
= control target key start
LH: loop header
LB: loop body
LE: loop exit
PB: predicated region body
PF: predicated region fallthrough
CT: control target
= control target key end

     0   :  { %12 = vsyncpa [#allocation3], 0  ;;  %s720_s0 = inlined_call_operand.hbm [shape: f32[8,12], index: 0, kind: input, shape index: {}]   ;;  %s721_s1 = inlined_call_operand.vmem [shape: s32[8,2], index: 1, kind: input, shape index: {}]   ;;  %s722_s2 = inlined_call_operand.vmem [shape: f32[12,128], index: 2, kind: input, shape index: {}]   ;;  %s723_s3 = inlined_call_operand.hbm [shape: f32[12,128], index: 3, kind: input, shape index: {}]   ;;  %s724_s4 = inlined_call_operand.vmem [shape: f32[1,128], index: 4, kind: input, shape index: {}]   ;;  %s725_s5 = inlined_call_operand.hbm [shape: f32[128,128], index: 5, kind: input, shape index: {}]   ;;  %s726_s6 = inlined_call_operand.vmem [shape: f32[1,128], index: 6, kind: input, shape index: {}]   ;;  %s727_s7 = inlined_call_operand.hbm [shape: f32[8,128], index: 7, kind: output, shape index: {}]  }
   0x1   :  { %13 = vsyncpa [#allocation6], 0 }
   0x2   :  { %14 = vsyncpa [#allocation4], 0  ;;  %s578_s24 = smov [#allocation5]   ;;  %s484_s28 = scalar_lea.hbm %s723_s3, 256 }
   0x3   :  { %s34_s25 = sshll.u32 %s578_s24, 4  ;;  %p485_p0 = scmp.ne.s32.totalorder %s723_s3, %s484_s28  ;;  %s35_s25 = int_to_ptr.vmem [resolvable:$true] %s34_s25 }
   0x4   :  { %p488_p1 = scmp.lt.u32.totalorder %s484_s28, %s723_s3 }
   0x6   :  { %p490_p2 = pnand %p488_p1, %p485_p0 }
   0x8   :  { %493 = shalt.err (!%p490_p2)
}
   0x9   :  { %s494_s10 = scalar_lea.vmem %s35_s25, 256  ;;  %p499_p4 = scmp.lt.s32.totalorder %s35_s25, %s35_s25 }
   0xa   :  { %p495_p3 = scmp.ne.s32.totalorder %s35_s25, %s494_s10  ;;  %p500_p5 = scmp.lt.s32.totalorder %s494_s10, %s494_s10 }
   0xc   :  { %p501_p6 = por %p500_p5, %p499_p4 }
   0xe   :  { %p502_p7 = pnand %p501_p6, %p495_p3 }
  0x10   :  { %505 = shalt.err (!%p502_p7)
}
  0x11   :  { %s579_s11 = smov 128   ;;  %s580_s12 = smov 8  }
  0x12   :  { %40 = dma.hbm_to_vmem [thread:$0]  %s723_s3, 256, %s35_s25, [#allocation6], %s579_s11, %s579_s11, %s580_s12  }
  0x13   :  { %s581_s15 = smov [#allocation2]   ;;  %s582_s17 = smov [#allocation7]  }
  0x14   :  { %s21_s16 = sshll.u32 %s581_s15, 4  ;;  %s48_s18 = sshll.u32 %s582_s17, 4  ;;  %s22_s16 = int_to_ptr.vmem [resolvable:$true] %s21_s16  ;;  %s49_s18 = int_to_ptr.vmem [resolvable:$true] %s48_s18 }
  0x15   :  { %s506_s21 = scalar_lea.hbm %s720_s0, 128 }
  0x16   :  { %p507_p8 = scmp.ne.s32.totalorder %s720_s0, %s506_s21  ;;  %p510_p9 = scmp.lt.u32.totalorder %s506_s21, %s720_s0 }
  0x18   :  { %p512_p10 = pnand %p510_p9, %p507_p8 }
  0x1a   :  { %515 = shalt.err (!%p512_p10)
}
  0x1b   :  { %s516_s3 = scalar_lea.vmem %s22_s16, 128  ;;  %p521_p12 = scmp.lt.s32.totalorder %s22_s16, %s22_s16 }
  0x1c   :  { %p517_p11 = scmp.ne.s32.totalorder %s22_s16, %s516_s3  ;;  %p522_p13 = scmp.lt.s32.totalorder %s516_s3, %s516_s3 }
  0x1e   :  { %p523_p0 = por %p522_p13, %p521_p12 }
  0x20   :  { %p524_p1 = pnand %p523_p0, %p517_p11 }
  0x22   :  { %527 = shalt.err (!%p524_p1)
}
  0x23   :  { %24 = dma.hbm_to_vmem [thread:$0]  %s720_s0, 128, %s22_s16, [#allocation3]  }
  0x24   :  { %s528_s30 = scalar_lea.hbm %s725_s5, 2048 }
  0x25   :  { %p529_p2 = scmp.ne.s32.totalorder %s725_s5, %s528_s30  ;;  %p532_p3 = scmp.lt.u32.totalorder %s528_s30, %s725_s5 }
  0x27   :  { %p534_p4 = pnand %p532_p3, %p529_p2 }
  0x29   :  { %537 = shalt.err (!%p534_p4)
}
  0x2a   :  { %s538_s14 = scalar_lea.vmem %s49_s18, 2048  ;;  %p543_p6 = scmp.lt.s32.totalorder %s49_s18, %s49_s18 }
  0x2b   :  { %p539_p5 = scmp.ne.s32.totalorder %s49_s18, %s538_s14  ;;  %p544_p7 = scmp.lt.s32.totalorder %s538_s14, %s538_s14 }
  0x2d   :  { %p545_p8 = por %p544_p7, %p543_p6 }
  0x2f   :  { %p546_p9 = pnand %p545_p8, %p539_p5 }
  0x31   :  { %549 = shalt.err (!%p546_p9)
}
  0x32   :  { %54 = dma.hbm_to_vmem [thread:$0]  %s725_s5, 2048, %s49_s18, [#allocation6], %s579_s11, %s579_s11, %s580_s12  }
  0x33   :  { %572 = dma.done.wait [#allocation3], 128  }
  0x34   :  { %573 = vsyncadd [#allocation3], 4294967168 }
  0x35   :  { %574 = dma.done.wait [#allocation6], 2304  }
  0x36   :  { %575 = vsyncadd [#allocation6], 4294964992  ;;  %v583_v0 = vmov 0   ;;  %v69_v1 = vld [vmem:[%s721_s1] sm:$0xff]  ;;  %v84_v2 = vld [vmem:[#allocation5] sm:$0xff]  ;;  %vm90_vm0 = vcmask 1043456   ;;  %v70_v25 = vlaneseq }
  0x37   :  { %482 = vset.pattern.permute.xlu0 %v583_v0  ;;  %v85_v3 = vld [vmem:[#allocation5 + $0x8] sm:$0xf]  ;;  %v76_v4 = vadd.s32 6, %v69_v1  ;;  %v584_v5 = vmov 0.0|0.0   ;;  %vm585_vm1 = vmmov 1   ;;  %v586_v8 = vmov 1  }
  0x38   :  { %73 = vperm.xlu0 %482, %v69_v1   ;;  %438 = vmatprep.subr.bf16.mxu1 %v584_v5  ;;  %v439_v6 = vpack.c.bf16 %v85_v3, %v84_v2  ;;  %vm677_vm2 = vmpackc.low %vm90_vm0, %vm585_vm1  ;;  %vm587_vm3 = vmmov 0   ;;  %v588_v9 = vmov 0.0   ;;  %v249_v10 = vld [vmem:[#allocation7] sm:$0xff]  ;;  %v250_v11 = vld [vmem:[#allocation7 + $0x8] sm:$0xff]  ;;  %v71_v27 = vand.u32 127, %v70_v25  ;;  %s589_s21 = smov [#allocation8]  }
  0x39   :  { %446 = vmatprep.subr.bf16.mxu0 %v584_v5  ;;  %393 = vmatprep.mubr.msk.f32.mxu1 %vm587_vm3, %v588_v9  ;;  %v251_v12 = vld [vmem:[#allocation7 + $0x10] sm:$0xff]  ;;  %v447_v13 = vpack.c.bf16 %v250_v11, %v249_v10  ;;  %v252_v14 = vld [vmem:[#allocation7 + $0x18] sm:$0xff]  ;;  %v253_v16 = vld [vmem:[#allocation7 + $0x20] sm:$0xff]  ;;  %vm86_vm6 = vcmask 97280   ;;  %s349_s22 = sshll.u32 %s589_s21, 4  ;;  %s350_s22 = int_to_ptr.vmem [resolvable:$true] %s349_s22 }
  0x3a   :  { %441 = vmatpush3.bf16.msk.msra.mxu1 %vm677_vm2, %v439_v6  ;;  %435 = vmatprep.mubr.msk.f32.mxu0 %vm587_vm3, %v588_v9  ;;  %v450_v15 = vpack.c.bf16 %v252_v14, %v251_v12  ;;  %v254_v17 = vld [vmem:[#allocation7 + $0x28] sm:$0xff]  ;;  %v255_v19 = vld [vmem:[#allocation7 + $0x30] sm:$0xff]  ;;  %v256_v20 = vld [vmem:[#allocation7 + $0x38] sm:$0xff]  ;;  %s550_s23 = scalar_lea.vmem %s350_s22, 128  ;;  %p555_p11 = scmp.lt.s32.totalorder %s350_s22, %s350_s22 }
  0x3b   :  { %442 = vmatprep.subr.bf16.mxu1 %v584_v5  ;;  %448 = vmatpush3.bf16.msra.mxu0 %v447_v13  ;;  %v453_v18 = vpack.c.bf16 %v254_v17, %v253_v16  ;;  %v456_v21 = vpack.c.bf16 %v256_v20, %v255_v19  ;;  %v257_v22 = vld [vmem:[#allocation7 + $0x40] sm:$0xff]  ;;  %v258_v23 = vld [vmem:[#allocation7 + $0x48] sm:$0xff]  ;;  %v68_v29 = vld [vmem:[%s722_s2 + $0x8] sm:$0xf]  ;;  %p551_p10 = scmp.ne.s32.totalorder %s350_s22, %s550_s23  ;;  %p556_p12 = scmp.lt.s32.totalorder %s550_s23, %s550_s23 }
  0x3c   :  { %483 = vset.pattern.permute.xlu0 %v586_v8  ;;  %449 = vmatprep.subr.bf16.mxu0 %v584_v5  ;;  %v459_v24 = vpack.c.bf16 %v258_v23, %v257_v22  ;;  %v67_v28 = vld [vmem:[%s722_s2] sm:$0xff]  ;;  %v259_v34 = vld [vmem:[#allocation7 + $0x50] sm:$0xff]  ;;  %v260_v35 = vld [vmem:[#allocation7 + $0x58] sm:$0xff] }
  0x3d   :  { %78 = vperm.xlu0 %483, %v76_v4   ;;  %v443_v31 = vpack.c.bf16 %v68_v29, %v67_v28  ;;  %v66_v33 = vld [vmem:[#allocation2] sm:$0xff]  ;;  %v462_v36 = vpack.c.bf16 %v260_v35, %v259_v34  ;;  %v261_v37 = vld [vmem:[#allocation7 + $0x60] sm:$0xff]  ;;  %v263_v40 = vld [vmem:[#allocation7 + $0x70] sm:$0xff]  ;;  %p557_p13 = por %p556_p12, %p555_p11 }
  0x3e   :  { %v262_v38 = vld [vmem:[#allocation7 + $0x68] sm:$0xff]  ;;  %v264_v41 = vld [vmem:[#allocation7 + $0x78] sm:$0xff] }
  0x3f   :  { %451 = vmatpush3.bf16.msra.mxu0 %v450_v15  ;;  %v465_v39 = vpack.c.bf16 %v262_v38, %v261_v37  ;;  %v468_v42 = vpack.c.bf16 %v264_v41, %v263_v40  ;;  %v364_v46 = vld [vmem:[%s724_s4] ss:$0 sm:$0xff]  ;;  %p558_p0 = pnand %p557_p13, %p551_p10 }
  0x40   :  { %452 = vmatprep.subr.bf16.mxu0 %v584_v5  ;;  %v365_v51 = vld [vmem:[%s726_s6] ss:$0 sm:$0xff] }
  0x43   :  { %454 = vmatpush3.bf16.msra.mxu0 %v453_v18 }
  0x44   :  { %455 = vmatprep.subr.bf16.mxu0 %v584_v5 }
  0x47   :  { %457 = vmatpush3.bf16.msra.mxu0 %v456_v21 }
  0x48   :  { %458 = vmatprep.subr.bf16.mxu0 %v584_v5 }
  0x4b   :  { %460 = vmatpush3.bf16.msra.mxu0 %v459_v24 }
  0x4c   :  { %461 = vmatprep.subr.bf16.mxu0 %v584_v5 }
  0x4f   :  { %463 = vmatpush3.bf16.msra.mxu0 %v462_v36 }
  0x50   :  { %464 = vmatprep.subr.bf16.mxu0 %v584_v5 }
  0x53   :  { %466 = vmatpush3.bf16.msra.mxu0 %v465_v39 }
  0x54   :  { %467 = vmatprep.subr.bf16.mxu0 %v584_v5 }
  0x57   :  { %469 = vmatpush3.bf16.msra.mxu0 %v468_v42 }
  0xb7   :  { %v74_v26 = vpop.permute.xlu0 %73 }
  0xb8   :  { %vm75_vm4 = vcmp.eq.s32.totalorder %v71_v27, %v74_v26 }
  0xbc   :  { %v79_v30 = vpop.permute.xlu0 %78 }
  0xbd   :  { %vm80_vm5 = vcmp.eq.s32.totalorder %v71_v27, %v79_v30 }
  0xbe   :  { %vm81_vm7 = vmor %vm75_vm4, %vm80_vm5 }
  0xbf   :  { %v359_v32 = vsel %vm81_vm7, 1.0, %v588_v9 }
  0xc0   :  { %394 = vmatmul.mubr.msk.f32.vlgmr.msra.gmra.mrb[0].mxu1 %vm86_vm6, %v359_v32 }
  0xc1   :  { %445 = vmatpush3.bf16.msk.msra.mxu1 %vm677_vm2, %v443_v31  ;;  %400 = vmatprep.mubr.msk.f32.mxu1 %vm587_vm3, %v588_v9 }
  0xc4   :  { %401 = vmatmul.mubr.msk.f32.vlgmr.msra.gmra.mrb[2].mxu1 %vm86_vm6, %v66_v33 }
 0x193   :  { %v160_v43 = vpop.f32.mrb[0].mxu1 }
 0x194   :  { %v395_v44 = vpop.f32.mrb[1].mxu1 }
 0x197   :  { %v236_v45 = vpop.f32.mrb[2].mxu1 }
 0x198   :  { %v237_v47 = vadd.f32 %v236_v45, %v160_v43  ;;  %v402_v48 = vpop.f32.mrb[3].mxu1 }
 0x19a   :  { %v247_v49 = vadd.f32 %v364_v46, %v237_v47 }
 0x19c   :  { %v248_v50 = vmax.f32 %v247_v49, 0.0 }
 0x19e   :  { %436 = vmatmul.mubr.f32.vlgmr.msra.gmra.mrb[0].mxu0 %v248_v50 }
 0x271   :  { %v338_v52 = vpop.f32.mrb[0].mxu0 }
 0x272   :  { %v339_v53 = vadd.f32 %v365_v51, %v338_v52  ;;  %v437_v54 = vpop.f32.mrb[1].mxu0 }
 0x274   :  { %342 = vst [vmem:[#allocation8] sm:$0xff] %v339_v53 }
 0x275   :  { %561 = shalt.err (!%p558_p0)
}
 0x276   :  { %s562_s26 = scalar_lea.hbm %s727_s7, 128 }
 0x277   :  { %p563_p1 = scmp.ne.s32.totalorder %s727_s7, %s562_s26  ;;  %p566_p2 = scmp.lt.u32.totalorder %s562_s26, %s727_s7 }
 0x279   :  { %p568_p3 = pnand %p566_p2, %p563_p1 }
 0x27b   :  { %571 = shalt.err (!%p568_p3)
}
 0x27c   :  { %352 = dma.vmem_to_hbm [thread:$0]  %s350_s22, 128, %s727_s7, [#allocation4]  }
 0x27d   :  { %576 = dma.done.wait [#allocation4], 128  }
 0x27e   :  { %577 = vsyncadd [#allocation4], 4294967168 }
 0x27f   :  { %356 = vsyncpa [#allocation3], 1 }
 0x280   :  { %357 = vsyncpa [#allocation6], 1 }
 0x281   :  { %358 = vsyncpa [#allocation4], 1 }

</bundles_post_ra>
